<compile_context>
chip_gen: v7x
topology: tpu7x:2x2x1
jax: 0.10.0
libtpu: 0.0.40
codegen_flags: <defaults>
</compile_context>

<pallas_src>
import functools
import math

import jax
import jax.numpy as jnp
from jax.experimental import pallas as pl
from jax.experimental.pallas import tpu as pltpu


_NEG_LARGE = -1e30            # masks padded logits out of the softmax (exp -> 0)
_VMEM_BUDGET = 40 << 20       # per-call VMEM target: fits v7x (64 MiB) with headroom


# ----------------------------- in-kernel helpers -----------------------------

def _group_reduce(v, A, Lp, op):
    """Reduce v (TB, A*Lp) across the A groups (flat col = a*Lp + l) per l.

    Group members for a fixed l sit at lane stride Lp; rolling the last axis by
    multiples of Lp stays inside the group (wraparound at A*Lp = full block
    width), so the reduction runs as XLU rolls + VPU max/add -- no sub-vreg
    slicing, no masked ops.
    """
    LAp = A * Lp
    if (A & (A - 1)) == 0:                    # power-of-two A: log2(A) tree steps
        s = Lp
        while s < LAp:
            v = op(v, pltpu.roll(v, shift=s, axis=1))
            s *= 2
        return v
    acc = v                                   # fallback: A-1 single rolls
    r = v
    for _ in range(A - 1):
        r = pltpu.roll(r, shift=Lp, axis=1)
        acc = op(acc, r)
    return acc


def _softmax_over_a(dec, A, Lp):
    """Numerically-stable softmax over the A axis of the (A, Lp)-flattened logits."""
    m = _group_reduce(dec, A, Lp, jnp.maximum)
    e = jnp.exp(dec - m)                      # EUP
    den = _group_reduce(e, A, Lp, jnp.add)
    inv = pl.reciprocal(den, approx=True)     # EUP slot (free-ish)
    inv = inv * (2.0 - den * inv)             # one Newton step -> ~full f32 precision
    return e * inv


# --------------------------------- kernels -----------------------------------

def lae_fused_kernel(x_ref, w_ref, b_ref, o_ref, *, A, Lp):
    """dec = x @ (W1 @ W2) + b2; softmax over A. All refs 2-D, lane-dense."""
    dec = jnp.dot(x_ref[...], w_ref[...], preferred_element_type=jnp.float32)
    dec = dec + b_ref[...]                    # bias kept in f32
    o_ref[...] = _softmax_over_a(dec, A, Lp).astype(o_ref.dtype)


def lae_two_matmul_kernel(x_ref, w1_ref, w2_ref, b_ref, o_ref, *, A, Lp):
    """Encoder/decoder kept separate (the R << LA regime: fewer FLOPs, less HBM)."""
    z = jnp.dot(x_ref[...], w1_ref[...], preferred_element_type=jnp.float32)
    dec = jnp.dot(z, w2_ref[...], preferred_element_type=jnp.float32) + b_ref[...]
    o_ref[...] = _softmax_over_a(dec, A, Lp).astype(o_ref.dtype)


# --------------------------------- wrapper -----------------------------------

def _const_spec(block_shape, const_bytes):
    """Spec for a grid-invariant operand (weights / bias).

    Once the constant footprint is non-trivial, drop the useless second pipeline
    buffer (the block index never changes), freeing VMEM for bigger batch tiles
    (matters on v7x's 64 MiB VMEM). Below the threshold the saving is noise and
    the default double-buffered spec is kept.
    """
    if const_bytes >= (4 << 20):
        return pl.BlockSpec(block_shape, lambda i: (0, 0),
                            pipeline_mode=pl.Buffered(1))
    return pl.BlockSpec(block_shape, lambda i: (0, 0))


def linear_autoencoder(x, w1, w2, b2, *, tile_b=None, fuse_weights=None,
                       stream_dtype=None):
    """x: (B, A, L); w1: (LA, R); w2: (R, LA); b2: (LA,). Returns (B, A, L)."""
    B, A, L = x.shape
    LA = L * A
    R = w1.shape[1]
    assert w1.shape == (LA, R) and w2.shape == (R, LA) and b2.shape == (LA,)

    sdtype = jnp.dtype(stream_dtype) if stream_dtype is not None else jnp.dtype(x.dtype)
    in_bytes = sdtype.itemsize

    # ---- group-aware lane padding so the flat width A*L_pad is a 128-multiple:
    # keeps the output store unmasked (lane-dense) and the rolls full-vreg.
    step = 128 // math.gcd(A, 128)
    L_pad = ((L + step - 1) // step) * step
    LAp = A * L_pad

    if fuse_weights is None:
        # Fusing W1@W2 only when it does not inflate per-tile FLOPs
        # (2*LA*LA <= 2*LA*2R) and the (LA,LA) product stays VMEM-small.
        fuse_weights = (2 * R >= LA) and (LAp * LAp * in_bytes <= _VMEM_BUDGET // 4)

    # Pad along the L axis of every (A, L)-structured operand; padded bias lanes
    # get -1e30 so the padded logits vanish under the softmax.
    if L_pad == L:
        x_p, w1_p, w2_p, b2_p = x, w1, w2, b2
    else:
        x_p = jnp.pad(x, ((0, 0), (0, 0), (0, L_pad - L)))
        w1_p = jnp.pad(w1.reshape(A, L, R),
                       ((0, 0), (0, L_pad - L), (0, 0))).reshape(LAp, R)
        w2_p = jnp.pad(w2.reshape(R, A, L),
                       ((0, 0), (0, 0), (0, L_pad - L))).reshape(R, LAp)
        b2_p = jnp.pad(b2.reshape(A, L), ((0, 0), (0, L_pad - L)),
                       constant_values=_NEG_LARGE).reshape(LAp)

    x_flat = x_p.reshape(B, LAp).astype(sdtype)      # glue: nn.Flatten (a*L + l)
    b2_2d = b2_p.reshape(1, LAp).astype(jnp.float32)  # tiny -> always stream f32

    if fuse_weights:
        # Cast the fused weight to the streaming dtype so a bf16 x tile meets a
        # bf16 weight on the MXU (no silent f32 promotion / double VMEM).
        w = jnp.dot(w1_p, w2_p, preferred_element_type=jnp.float32).astype(sdtype)
        const_bytes = LAp * LAp * in_bytes + LAp * 4
    else:
        w1_p = w1_p.astype(sdtype)
        w2_p = w2_p.astype(sdtype)
        const_bytes = 2 * LAp * R * in_bytes + LAp * 4

    # ---- batch tiling: biggest tile that fits the VMEM budget (HBM-bound kernel,
    # big tiles == high HBM utilization); single full-batch step when it all fits.
    per_row = LAp * in_bytes * 2 * 2          # x tile + out tile, double-buffered
    if tile_b is None:
        cap = (_VMEM_BUDGET - 2 * const_bytes) // per_row
        cap = max(8, min(int(cap), 1024))
        tile_b = B if B <= cap else max(8, (cap // 8) * 8)
    else:
        assert tile_b % 8 == 0 or tile_b >= B, "tile_b must be a multiple of 8"
    B_pad = pl.cdiv(B, tile_b) * tile_b
    if B_pad != B:
        x_flat = jnp.pad(x_flat, ((0, B_pad - B), (0, 0)))
    grid = (B_pad // tile_b,)

    # Explicit scoped-VMEM budget sized from the actual buffers; clamp 32..48 MiB
    # (>= default everywhere, still well inside v7x's 64 MiB physical VMEM).
    needed = 2 * const_bytes + tile_b * per_row
    vmem_limit = int(min(48 << 20, max(32 << 20, needed + (needed >> 2) + (1 << 20))))

    x_spec = pl.BlockSpec((tile_b, LAp), lambda i: (i, 0))
    out_spec = pl.BlockSpec((tile_b, LAp), lambda i: (i, 0))   # lane-dense output
    b_spec = _const_spec((1, LAp), const_bytes)

    if fuse_weights:
        kernel = functools.partial(lae_fused_kernel, A=A, Lp=L_pad)
        in_specs = [x_spec, _const_spec((LAp, LAp), const_bytes), b_spec]
        operands = (x_flat, w, b2_2d)
        flops = 2 * B_pad * LAp * LAp
    else:
        kernel = functools.partial(lae_two_matmul_kernel, A=A, Lp=L_pad)
        in_specs = [x_spec,
                    _const_spec((LAp, R), const_bytes),
                    _const_spec((R, LAp), const_bytes),
                    b_spec]
        operands = (x_flat, w1_p, w2_p, b2_2d)
        flops = 4 * B_pad * LAp * R
    bytes_accessed = in_bytes * 2 * B_pad * LAp + const_bytes

    out_flat = pl.pallas_call(
        kernel,
        out_shape=jax.ShapeDtypeStruct((B_pad, LAp), sdtype),
        grid=grid,
        in_specs=in_specs,
        out_specs=out_spec,
        compiler_params=pltpu.CompilerParams(
            dimension_semantics=("parallel",),     # shards batch tiles across v7x's 2 TCs
            vmem_limit_bytes=vmem_limit),
        cost_estimate=pl.CostEstimate(
            flops=int(flops),
            transcendentals=int(B_pad * LAp),
            bytes_accessed=int(bytes_accessed)),
    )(*operands)

    # glue: undo flatten (Reshape([A, L])), drop batch/lane padding.
    out = out_flat.reshape(B_pad, A, L_pad)
    if B_pad != B or L_pad != L:
        out = out[:B, :, :L]
    return out


def reference(x, w1, w2, b2):
    B, A, L = x.shape
    y = x.reshape(B, -1)
    y = y @ w1
    y = y @ w2 + b2
    y = y.reshape(B, A, L)
    return jax.nn.softmax(y, axis=1)


if __name__ == "__main__":
    key = jax.random.PRNGKey(0)
    keys = jax.random.split(key, 8)

    # --- Test 1: canonical shapes, R << LA  ->  two-matmul path, f32 ---
    B, A, L, RANK = 16, 8, 16, 32
    LA = L * A
    x = jax.random.normal(keys[0], (B, A, L), dtype=jnp.float32)
    # PyTorch Linear stores W as (out, in); we keep the transposed x @ W form.
    w1 = jax.random.normal(keys[1], (LA, RANK), dtype=jnp.float32) * (1.0 / jnp.sqrt(LA))
    w2 = jax.random.normal(keys[2], (RANK, LA), dtype=jnp.float32) * (1.0 / jnp.sqrt(RANK))
    b2 = jax.random.normal(keys[3], (LA,), dtype=jnp.float32) * 0.01

    out = jax.block_until_ready(linear_autoencoder(x, w1, w2, b2))
    ref = reference(x, w1, w2, b2)
    assert out.shape == (B, A, L)
    assert jnp.allclose(out, ref, atol=1e-5, rtol=1e-4), "f32 two-matmul mismatch"

    # --- Test 2: A*L not a multiple of 128 (group-aware padding) + fused path ---
    B2, A2, L2, R2 = 8, 4, 10, 32          # 2*R >= A*L -> fused kernel
    LA2 = A2 * L2
    x2 = jax.random.normal(keys[4], (B2, A2, L2), dtype=jnp.float32)
    w1b = jax.random.normal(keys[5], (LA2, R2), dtype=jnp.float32) * (1.0 / jnp.sqrt(LA2))
    w2b = jax.random.normal(keys[6], (R2, LA2), dtype=jnp.float32) * (1.0 / jnp.sqrt(R2))
    b2b = jax.random.normal(keys[7], (LA2,), dtype=jnp.float32) * 0.01

    out2 = jax.block_until_ready(linear_autoencoder(x2, w1b, w2b, b2b))
    ref2 = reference(x2, w1b, w2b, b2b)
    assert out2.shape == (B2, A2, L2)
    assert jnp.allclose(out2, ref2, atol=2e-5, rtol=1e-4), "padded/fused mismatch"

    # --- Test 3: bf16 streaming (halved HBM traffic), f32 accumulate + softmax ---
    out_bf = jax.block_until_ready(
        linear_autoencoder(x, w1, w2, b2, stream_dtype=jnp.bfloat16))
    assert out_bf.dtype == jnp.bfloat16 and out_bf.shape == (B, A, L)
    xb = x.astype(jnp.bfloat16).astype(jnp.float32)
    w1r = w1.astype(jnp.bfloat16).astype(jnp.float32)
    w2r = w2.astype(jnp.bfloat16).astype(jnp.float32)
    ref_bf = reference(xb, w1r, w2r, b2)
    err = jnp.max(jnp.abs(out_bf.astype(jnp.float32) - ref_bf))
    assert err < 2e-2, f"bf16 streaming mismatch: max abs err {err}"

    print("KERNEL_OK")
</pallas_src>

<mosaic_0001>
module attributes {stable_mosaic.version = 11 : i64} {
  func.func @lae_two_matmul_kernel(%arg0: i32, %arg1: memref<16x128xf32, #tpu.memory_space<vmem>>, %arg2: memref<128x32xf32, #tpu.memory_space<vmem>>, %arg3: memref<32x128xf32, #tpu.memory_space<vmem>>, %arg4: memref<1x128xf32, #tpu.memory_space<vmem>>, %arg5: memref<16x128xf32, #tpu.memory_space<vmem>>) attributes {dimension_semantics = [#tpu.dimension_semantics<parallel>], iteration_bounds = array<i64: 1>, scalar_prefetch = 0 : i64, scratch_operands = 0 : i64, tpu.core_type = #tpu.core_type<tc>, window_params = [{transform_indices = @transform_0, window_bounds = array<i64: 16, 128>}, {pipeline_mode = #tpu.pipeline_mode<synchronous>, transform_indices = @transform_1, window_bounds = array<i64: 128, 32>}, {pipeline_mode = #tpu.pipeline_mode<synchronous>, transform_indices = @transform_2, window_bounds = array<i64: 32, 128>}, {pipeline_mode = #tpu.pipeline_mode<synchronous>, transform_indices = @transform_3, window_bounds = array<i64: 1, 128>}, {transform_indices = @transform_4, window_bounds = array<i64: 16, 128>}]} {
    %c0 = arith.constant 0 : index
    %c0_0 = arith.constant 0 : index
    %0 = vector.load %arg1[%c0, %c0_0] : memref<16x128xf32, #tpu.memory_space<vmem>>, vector<16x128xf32>
    %c0_1 = arith.constant 0 : index
    %c0_2 = arith.constant 0 : index
    %1 = vector.load %arg2[%c0_1, %c0_2] : memref<128x32xf32, #tpu.memory_space<vmem>>, vector<128x32xf32>
    %cst = arith.constant dense<0.000000e+00> : vector<16x32xf32>
    %2 = tpu.matmul %0, %1, %cst {dimension_numbers = #tpu.dot_dimension_numbers<[1], [0], [0], [1], [0, 0, 1, 1], [], []>} : vector<16x128xf32>, vector<128x32xf32>, vector<16x32xf32> -> vector<16x32xf32>
    %c0_3 = arith.constant 0 : index
    %c0_4 = arith.constant 0 : index
    %3 = vector.load %arg3[%c0_3, %c0_4] : memref<32x128xf32, #tpu.memory_space<vmem>>, vector<32x128xf32>
    %cst_5 = arith.constant dense<0.000000e+00> : vector<16x128xf32>
    %4 = tpu.matmul %2, %3, %cst_5 {dimension_numbers = #tpu.dot_dimension_numbers<[1], [0], [0], [1], [0, 0, 1, 1], [], []>} : vector<16x32xf32>, vector<32x128xf32>, vector<16x128xf32> -> vector<16x128xf32>
    %c0_6 = arith.constant 0 : index
    %c0_7 = arith.constant 0 : index
    %5 = vector.load %arg4[%c0_6, %c0_7] : memref<1x128xf32, #tpu.memory_space<vmem>>, vector<1x128xf32>
    %6 = vector.broadcast %5 : vector<1x128xf32> to vector<16x128xf32>
    %7 = arith.addf %4, %6 : vector<16x128xf32>
    %c16_i32 = arith.constant 16 : i32
    %8 = tpu.dynamic_rotate %7 by %c16_i32 dim 1 : vector<16x128xf32>, i32 -> vector<16x128xf32>
    %9 = arith.maximumf %7, %8 : vector<16x128xf32>
    %c32_i32 = arith.constant 32 : i32
    %10 = tpu.dynamic_rotate %9 by %c32_i32 dim 1 : vector<16x128xf32>, i32 -> vector<16x128xf32>
    %11 = arith.maximumf %9, %10 : vector<16x128xf32>
    %c64_i32 = arith.constant 64 : i32
    %12 = tpu.dynamic_rotate %11 by %c64_i32 dim 1 : vector<16x128xf32>, i32 -> vector<16x128xf32>
    %13 = arith.maximumf %11, %12 : vector<16x128xf32>
    %14 = arith.subf %7, %13 : vector<16x128xf32>
    %15 = math.exp %14 : vector<16x128xf32>
    %c16_i32_8 = arith.constant 16 : i32
    %16 = tpu.dynamic_rotate %15 by %c16_i32_8 dim 1 : vector<16x128xf32>, i32 -> vector<16x128xf32>
    %17 = arith.addf %15, %16 : vector<16x128xf32>
    %c32_i32_9 = arith.constant 32 : i32
    %18 = tpu.dynamic_rotate %17 by %c32_i32_9 dim 1 : vector<16x128xf32>, i32 -> vector<16x128xf32>
    %19 = arith.addf %17, %18 : vector<16x128xf32>
    %c64_i32_10 = arith.constant 64 : i32
    %20 = tpu.dynamic_rotate %19 by %c64_i32_10 dim 1 : vector<16x128xf32>, i32 -> vector<16x128xf32>
    %21 = arith.addf %19, %20 : vector<16x128xf32>
    %22 = tpu.reciprocal %21 {approx = true} : vector<16x128xf32> -> vector<16x128xf32>
    %23 = arith.mulf %21, %22 : vector<16x128xf32>
    %cst_11 = arith.constant 2.000000e+00 : f32
    %24 = vector.broadcast %cst_11 : f32 to vector<16x128xf32>
    %25 = arith.subf %24, %23 : vector<16x128xf32>
    %26 = arith.mulf %22, %25 : vector<16x128xf32>
    %27 = arith.mulf %15, %26 : vector<16x128xf32>
    %c0_12 = arith.constant 0 : index
    %c0_13 = arith.constant 0 : index
    %28 = vector.load %arg5[%c0_12, %c0_13] : memref<16x128xf32, #tpu.memory_space<vmem>>, vector<16x128xf32>
    tpu.vector_store %arg5[%c0_12, %c0_13], %27 {strides = array<i32>} : memref<16x128xf32, #tpu.memory_space<vmem>>, vector<16x128xf32>,
    return
  }
  func.func @transform_0(%arg0: i32) -> (i32, i32) {
    %c0_i32 = arith.constant 0 : i32
    %c0_i32_0 = arith.constant 0 : i32
    return %arg0, %c0_i32 : i32, i32
  }
  func.func @transform_1(%arg0: i32) -> (i32, i32) {
    %c0_i32 = arith.constant 0 : i32
    %c0_i32_0 = arith.constant 0 : i32
    %c0_i32_1 = arith.constant 0 : i32
    return %c0_i32, %c0_i32_0 : i32, i32
  }
  func.func @transform_2(%arg0: i32) -> (i32, i32) {
    %c0_i32 = arith.constant 0 : i32
    %c0_i32_0 = arith.constant 0 : i32
    %c0_i32_1 = arith.constant 0 : i32
    return %c0_i32, %c0_i32_0 : i32, i32
  }
  func.func @transform_3(%arg0: i32) -> (i32, i32) {
    %c0_i32 = arith.constant 0 : i32
    %c0_i32_0 = arith.constant 0 : i32
    %c0_i32_1 = arith.constant 0 : i32
    return %c0_i32, %c0_i32_0 : i32, i32
  }
  func.func @transform_4(%arg0: i32) -> (i32, i32) {
    %c0_i32 = arith.constant 0 : i32
    %c0_i32_0 = arith.constant 0 : i32
    return %arg0, %c0_i32 : i32, i32
  }
}

</mosaic_0001>

<bundles_post_ra>
// kernel: tpu_custom_call.1
= control target key start
LH: loop header
LB: loop body
LE: loop exit
PB: predicated region body
PF: predicated region fallthrough
CT: control target
= control target key end

     0   :  { %s545_s0 = inlined_call_operand.vmem [shape: f32[16,128], index: 0, kind: input, shape index: {}]   ;;  %s546_s1 = inlined_call_operand.vmem [shape: f32[128,32], index: 1, kind: input, shape index: {}]   ;;  %s547_s2 = inlined_call_operand.vmem [shape: f32[32,128], index: 2, kind: input, shape index: {}]   ;;  %s548_s3 = inlined_call_operand.vmem [shape: f32[1,128], index: 3, kind: input, shape index: {}]   ;;  %s549_s4 = inlined_call_operand.hbm [shape: f32[16,128], index: 4, kind: output, shape index: {}]  }
   0x1   :  { %v20_v0 = vld [vmem:[%s546_s1] sm:$0xff]  ;;  %v21_v1 = vld [vmem:[%s546_s1 + $0x8] sm:$0xff]  ;;  %v22_v2 = vld [vmem:[%s546_s1 + $0x10] sm:$0xff] }
   0x2   :  { %v347_v3 = vpack.c.bf16 %v21_v1, %v20_v0  ;;  %v23_v4 = vld [vmem:[%s546_s1 + $0x18] sm:$0xff]  ;;  %v24_v6 = vld [vmem:[%s546_s1 + $0x20] sm:$0xff]  ;;  %v25_v7 = vld [vmem:[%s546_s1 + $0x28] sm:$0xff] }
   0x3   :  { %v351_v5 = vpack.c.bf16 %v23_v4, %v22_v2  ;;  %v355_v8 = vpack.c.bf16 %v25_v7, %v24_v6  ;;  %v26_v9 = vld [vmem:[%s546_s1 + $0x30] sm:$0xff]  ;;  %v27_v10 = vld [vmem:[%s546_s1 + $0x38] sm:$0xff]  ;;  %v18_v11 = vld [vmem:[%s545_s0] sm:$0xff] }
   0x4   :  { %348 = vmatprep.subr.bf16.mxu0 %v347_v3  ;;  %333 = vmatprep.mubr.f32.mxu0 %v18_v11  ;;  %v111_v12 = vld [vmem:[%s547_s2] sm:$0xff]  ;;  %v112_v13 = vld [vmem:[%s547_s2 + $0x8] sm:$0xff]  ;;  %v113_v14 = vld [vmem:[%s547_s2 + $0x10] sm:$0xff] }
   0x5   :  { %350 = vmatpush3.bf16.msra.mxu0 %v347_v3  ;;  %v379_v15 = vpack.c.bf16 %v112_v13, %v111_v12  ;;  %v114_v16 = vld [vmem:[%s547_s2 + $0x18] sm:$0xff] }
   0x6   :  { %352 = vmatprep.subr.bf16.mxu0 %v351_v5 }
   0x7   :  { %9 = vsyncpa [#allocation3], 0  ;;  %v383_v17 = vpack.c.bf16 %v114_v16, %v113_v14  ;;  %v359_v18 = vpack.c.bf16 %v27_v10, %v26_v9  ;;  %380 = vmatprep.subr.bf16.mxu1 %v379_v15  ;;  %v28_v19 = vld [vmem:[%s546_s1 + $0x40] sm:$0xff]  ;;  %v29_v20 = vld [vmem:[%s546_s1 + $0x48] sm:$0xff]  ;;  %vm122_vm0 = vcmask 261120   ;;  %s428_s8 = smov [#allocation2]  }
   0x8   :  { %382 = vmatpush3.bf16.msra.mxu1 %v379_v15  ;;  %v363_v21 = vpack.c.bf16 %v29_v20, %v28_v19  ;;  %v30_v22 = vld [vmem:[%s546_s1 + $0x50] sm:$0xff]  ;;  %v31_v23 = vld [vmem:[%s546_s1 + $0x58] sm:$0xff]  ;;  %v32_v25 = vld [vmem:[%s546_s1 + $0x60] sm:$0xff]  ;;  %s263_s9 = sshll.u32 %s428_s8, 4  ;;  %s264_s9 = int_to_ptr.vmem [resolvable:$true] %s263_s9 }
   0x9   :  { %354 = vmatpush3.bf16.msra.mxu0 %v351_v5  ;;  %384 = vmatprep.subr.bf16.mxu1 %v383_v17  ;;  %v367_v24 = vpack.c.bf16 %v31_v23, %v30_v22  ;;  %v33_v26 = vld [vmem:[%s546_s1 + $0x68] sm:$0xff]  ;;  %v34_v28 = vld [vmem:[%s546_s1 + $0x70] sm:$0xff]  ;;  %v35_v29 = vld [vmem:[%s546_s1 + $0x78] sm:$0xff]  ;;  %s425_s1 = smov 16   ;;  %s401_s10 = scalar_lea.vmem %s264_s9, 256 }
   0xa   :  { %356 = vmatprep.subr.bf16.mxu0 %v355_v8  ;;  %v371_v27 = vpack.c.bf16 %v33_v26, %v32_v25  ;;  %v375_v30 = vpack.c.bf16 %v35_v29, %v34_v28  ;;  %v19_v31 = vld [vmem:[%s545_s0 + $0x8] sm:$0xff]  ;;  %v274_v34 = vld [vmem:[%s548_s3] ss:$0 sm:$0xff]  ;;  %s426_s0 = smov 32   ;;  %s427_s3 = smov 64  }
   0xb   :  { %p402_p0 = scmp.ne.s32.totalorder %s264_s9, %s401_s10  ;;  %p406_p1 = scmp.lt.s32.totalorder %s264_s9, %s264_s9 }
   0xc   :  { %386 = vmatpush3.bf16.msra.mxu1 %v383_v17  ;;  %p407_p2 = scmp.lt.s32.totalorder %s401_s10, %s401_s10 }
   0xd   :  { %358 = vmatpush3.bf16.msra.mxu0 %v355_v8 }
   0xe   :  { %360 = vmatprep.subr.bf16.mxu0 %v359_v18  ;;  %p408_p3 = por %p407_p2, %p406_p1 }
  0x10   :  { %p409_p4 = pnand %p408_p3, %p402_p0 }
  0x11   :  { %362 = vmatpush3.bf16.msra.mxu0 %v359_v18 }
  0x12   :  { %364 = vmatprep.subr.bf16.mxu0 %v363_v21 }
  0x15   :  { %366 = vmatpush3.bf16.msra.mxu0 %v363_v21 }
  0x16   :  { %368 = vmatprep.subr.bf16.mxu0 %v367_v24 }
  0x19   :  { %370 = vmatpush3.bf16.msra.mxu0 %v367_v24 }
  0x1a   :  { %372 = vmatprep.subr.bf16.mxu0 %v371_v27 }
  0x1d   :  { %374 = vmatpush3.bf16.msra.mxu0 %v371_v27 }
  0x1e   :  { %376 = vmatprep.subr.bf16.mxu0 %v375_v30 }
  0x21   :  { %378 = vmatpush3.bf16.msra.mxu0 %v375_v30 }
  0x24   :  { %334 = vmatmul.mubr.f32.vlgmr.msra.gmra.mrb[0].mxu0 %v19_v31 }
  0xf7   :  { %v335_v32 = vpop.f32.mrb[0].mxu0 }
  0xf8   :  { %v102_v33 = vpop.f32.mrb[1].mxu0 }
  0xf9   :  { %344 = vmatprep.mubr.msk.f32.mxu1 %vm122_vm0, %v102_v33 }
  0xfa   :  { %345 = vmatmul.mubr.msk.f32.vlgmr.msra.gmra.mrb[0].mxu1 %vm122_vm0, %v335_v32 }
 0x1cd   :  { %v346_v35 = vpop.f32.mrb[0].mxu1 }
 0x1ce   :  { %v195_v36 = vpop.f32.mrb[1].mxu1  ;;  %v201_v38 = vadd.f32 %v346_v35, %v274_v34 }
 0x1cf   :  { %v196_v37 = vadd.f32 %v274_v34, %v195_v36 }
 0x1d1   :  { %204 = vrot.lane.b32.xlu0 %v196_v37, %s425_s1 }
 0x1d5   :  { %206 = vrot.lane.b32.xlu0 %v201_v38, %s425_s1 }
 0x243   :  { %v205_v39 = vpop.permute.xlu0 %204 }
 0x244   :  { %v208_v40 = vmax.f32 %v196_v37, %v205_v39 }
 0x246   :  { %210 = vrot.lane.b32.xlu1 %v208_v40, %s426_s0 }
 0x247   :  { %v207_v41 = vpop.permute.xlu0 %206 }
 0x248   :  { %v209_v42 = vmax.f32 %v201_v38, %v207_v41 }
 0x24a   :  { %212 = vrot.lane.b32.xlu1 %v209_v42, %s426_s0 }
 0x2b8   :  { %v211_v43 = vpop.permute.xlu1 %210 }
 0x2b9   :  { %v214_v44 = vmax.f32 %v208_v40, %v211_v43 }
 0x2bb   :  { %216 = vrot.lane.b32.xlu0 %v214_v44, %s427_s3 }
 0x2bc   :  { %v213_v45 = vpop.permute.xlu1 %212 }
 0x2bd   :  { %v215_v46 = vmax.f32 %v209_v42, %v213_v45 }
 0x2bf   :  { %218 = vrot.lane.b32.xlu1 %v215_v46, %s427_s3 }
 0x32d   :  { %v217_v47 = vpop.permute.xlu0 %216 }
 0x32e   :  { %v220_v48 = vmax.f32 %v214_v44, %v217_v47 }
 0x330   :  { %v222_v49 = vsub.f32 %v196_v37, %v220_v48 }
 0x331   :  { %v219_v50 = vpop.permute.xlu1 %218 }
 0x332   :  { %v224_v51 = vmul.f32 1.442695, %v222_v49  ;;  %v221_v52 = vmax.f32 %v215_v46, %v219_v50 }
 0x334   :  { %393 = vpow2.f32 %v224_v51  ;;  %v223_v53 = vsub.f32 %v201_v38, %v221_v52 }
 0x336   :  { %v226_v54 = vmul.f32 1.442695, %v223_v53 }
 0x338   :  { %395 = vpow2.f32 %v226_v54 }
 0x33e   :  { %v394_v55 = vpop.eup %393 }
 0x33f   :  { %228 = vrot.lane.b32.xlu0 %v394_v55, %s425_s1 }
 0x342   :  { %v396_v56 = vpop.eup %395 }
 0x343   :  { %230 = vrot.lane.b32.xlu1 %v396_v56, %s425_s1 }
 0x3b1   :  { %v229_v57 = vpop.permute.xlu0 %228 }
 0x3b2   :  { %v232_v58 = vadd.f32 %v394_v55, %v229_v57 }
 0x3b4   :  { %234 = vrot.lane.b32.xlu0 %v232_v58, %s426_s0 }
 0x3b5   :  { %v231_v59 = vpop.permute.xlu1 %230 }
 0x3b6   :  { %v233_v60 = vadd.f32 %v396_v56, %v231_v59 }
 0x3b8   :  { %236 = vrot.lane.b32.xlu1 %v233_v60, %s426_s0 }
 0x426   :  { %v235_v61 = vpop.permute.xlu0 %234 }
 0x427   :  { %v238_v62 = vadd.f32 %v235_v61, %v232_v58 }
 0x429   :  { %240 = vrot.lane.b32.xlu0 %v238_v62, %s427_s3 }
 0x42a   :  { %v237_v63 = vpop.permute.xlu1 %236 }
 0x42b   :  { %v239_v0 = vadd.f32 %v237_v63, %v233_v60 }
 0x42d   :  { %242 = vrot.lane.b32.xlu1 %v239_v0, %s427_s3 }
 0x49b   :  { %v241_v1 = vpop.permute.xlu0 %240 }
 0x49c   :  { %v244_v2 = vadd.f32 %v241_v1, %v238_v62 }
 0x49e   :  { %397 = vrcp.f32 %v244_v2 }
 0x49f   :  { %v243_v3 = vpop.permute.xlu1 %242 }
 0x4a0   :  { %v245_v4 = vadd.f32 %v243_v3, %v239_v0 }
 0x4a2   :  { %399 = vrcp.f32 %v245_v4 }
 0x4a8   :  { %v398_v5 = vpop.eup %397 }
 0x4a9   :  { %v248_v6 = vmul.f32 %v398_v5, %v244_v2 }
 0x4ab   :  { %v250_v7 = vsub.f32 2.0, %v248_v6 }
 0x4ac   :  { %v400_v8 = vpop.eup %399 }
 0x4ad   :  { %v252_v9 = vmul.f32 %v398_v5, %v250_v7  ;;  %v249_v10 = vmul.f32 %v400_v8, %v245_v4 }
 0x4af   :  { %v254_v11 = vmul.f32 %v394_v55, %v252_v9  ;;  %v251_v12 = vsub.f32 2.0, %v249_v10 }
 0x4b1   :  { %256 = vst [vmem:[#allocation2] sm:$0xff] %v254_v11  ;;  %v253_v13 = vmul.f32 %v400_v8, %v251_v12 }
 0x4b3   :  { %v255_v14 = vmul.f32 %v396_v56, %v253_v13 }
 0x4b5   :  { %257 = vst [vmem:[#allocation2 + $0x8] sm:$0xff] %v255_v14 }
 0x4b6   :  { %412 = shalt.err (!%p409_p4)
}
 0x4b7   :  { %s413_s13 = scalar_lea.hbm %s549_s4, 256 }
 0x4b8   :  { %p414_p5 = scmp.ne.s32.totalorder %s549_s4, %s413_s13  ;;  %p417_p6 = scmp.lt.u32.totalorder %s413_s13, %s549_s4 }
 0x4ba   :  { %p419_p7 = pnand %p417_p6, %p414_p5 }
 0x4bc   :  { %422 = shalt.err (!%p419_p7)
}
 0x4bd   :  { %s429_s18 = smov 128   ;;  %s430_s2 = smov 8  }
 0x4be   :  { %269 = dma.vmem_to_hbm [thread:$0]  %s264_s9, 256, %s549_s4, [#allocation3], %s429_s18, %s429_s18, %s430_s2  }
 0x4bf   :  { %423 = dma.done.wait [#allocation3], 256  }
 0x4c0   :  { %424 = vsyncadd [#allocation3], 4294967040 }
 0x4c1   :  { %273 = vsyncpa [#allocation3], 1 }

</bundles_post_ra>
